<compile_context>
chip_gen: v7x
topology: tpu7x:2x2x1
jax: 0.10.0
libtpu: 0.0.40
codegen_flags: <defaults>
</compile_context>

<pallas_src>
import functools

import jax
import jax.numpy as jnp
from jax.experimental import pallas as pl
from jax.experimental.pallas import tpu as pltpu

EPS = 1e-5     # PyTorch nn.LayerNorm default eps
LANE = 128


def _round_up(x, m):
    return (x + m - 1) // m * m


def _vmem_budget_bytes():
    """~80% of per-core VMEM (64 MiB on v7x, 128 MiB on v5e/v6e)."""
    try:
        cap = int(pltpu.get_tpu_info().vmem_capacity_bytes)
    except Exception:
        cap = 64 << 20            # conservative fallback: fits every generation
    return int(0.8 * cap)


def _sigmoid(v):
    # sigmoid(x) = 0.5 * tanh(x/2) + 0.5 : one EUP op (tanh) instead of exp + recip.
    return 0.5 * jnp.tanh(0.5 * v) + 0.5


def layer_kernel(xx_ref, hx_ref, pp_ref, wh_ref, wx_ref, out_ref, *, n_actual):
    """One batch tile of the Layer forward.

    xx_ref : [TB, P, Np]   pathway inputs at t = T-1 (padded lanes are zero)
    hx_ref : [TB, Np]      previous hidden state     (padded lanes are zero)
    pp_ref : [5, P, Np]    packed params: ng | nb | ag | ab | lnx_bias (row-broadcast)
    wh_ref : [Np, 2Np]     fused h2h weight (transposed, [whi | whg], zero-padded)
    wx_ref : [Np, Np]      x2h weight (transposed, zero-padded)
    out_ref: [TB, Np]      new hidden state
    """
    xx = xx_ref[...]                       # [TB, P, Np]  f32
    hx = hx_ref[...]                       # [TB, Np]     f32
    Np = hx.shape[-1]

    inv_n = 1.0 / n_actual
    inv_2n = 1.0 / (2 * n_actual)

    # ---- unpack packed per-pathway params (leading-axis indexing, layout-friendly)
    ng = pp_ref[0][None]                   # [1, P, Np]
    nb = pp_ref[1][None]
    ag = pp_ref[2][None]
    ab = pp_ref[3][None]
    lnx_b = pp_ref[4][0:1, :]              # [1, Np]

    # ---- Layer.norm : LayerNorm over out_neurons (dim=2), affine per (P, N).
    # One-pass sum / sumsq; padded xx lanes are zero so the raw sums are exact,
    # and ng/nb padded lanes are zero so xn's padded lanes stay zero.
    s1 = jnp.sum(xx, -1, keepdims=True)
    q1 = jnp.sum(xx * xx, -1, keepdims=True)
    mu1 = s1 * inv_n
    var1 = jnp.maximum(q1 * inv_n - mu1 * mu1, 0.0)
    xn = (xx - mu1) * jax.lax.rsqrt(var1 + EPS) * ng + nb        # [TB, P, Np]

    # ---- affine_layer(hx repeated over P) -> sigmoid -> gate -> sum over P -> relu
    g = _sigmoid(hx[:, None, :] * ag + ab)                       # [TB, P, Np]
    in_layer = jnp.maximum(jnp.sum(g * xn, axis=1), 0.0)         # [TB, Np]

    # ---- Integrator.h2h : fused Linear(N -> 2N, no bias) + joint LN over 2N.
    h2h = jnp.dot(hx.astype(wh_ref.dtype), wh_ref[...],
                  preferred_element_type=jnp.float32)            # [TB, 2Np]
    s2 = jnp.sum(h2h, -1, keepdims=True)
    q2 = jnp.sum(h2h * h2h, -1, keepdims=True)
    mu2 = s2 * inv_2n
    var2 = jnp.maximum(q2 * inv_2n - mu2 * mu2, 0.0)
    h2h_n = (h2h - mu2) * (jax.lax.rsqrt(var2 + EPS) * 0.1)      # LN2: w=0.1, b=0
    h_i = h2h_n[:, :Np]
    h_g = h2h_n[:, Np:]

    # ---- x = activation(in_layer + h_i)   (relu)
    x = jnp.maximum(in_layer + h_i, 0.0)                         # [TB, Np]

    # ---- x2h : Linear(N -> N, no bias) + LayerNorm(N, w=0.1, b=-log U(1, Tmax-1))
    # TODO(synk): for large Np (MXU-bound) split TB into 2 sub-chunks so the x2h dot
    # of one chunk overlaps the LN/gate elementwise work of the other.
    x2h_raw = jnp.dot(x.astype(wx_ref.dtype), wx_ref[...],
                      preferred_element_type=jnp.float32)        # [TB, Np]
    s3 = jnp.sum(x2h_raw, -1, keepdims=True)
    q3 = jnp.sum(x2h_raw * x2h_raw, -1, keepdims=True)
    mu3 = s3 * inv_n
    var3 = jnp.maximum(q3 * inv_n - mu3 * mu3, 0.0)
    x2h = (x2h_raw - mu3) * (jax.lax.rsqrt(var3 + EPS) * 0.1) + lnx_b

    gg = _sigmoid(x2h + h_g)
    out_ref[...] = ((1.0 - gg) * hx + gg * x).astype(out_ref.dtype)


def make_params(key, P, N, Tmax):
    k_h2h, k_x2h, k_lnb = jax.random.split(key, 3)
    bound = 1.0 / jnp.sqrt(N)
    # nn.Linear default init ~ U(-1/sqrt(fan_in), 1/sqrt(fan_in)); stored transposed
    # so that y = x @ W.
    w_h2h = jax.random.uniform(k_h2h, (N, 2 * N), jnp.float32, -bound, bound)
    w_x2h = jax.random.uniform(k_x2h, (N, N), jnp.float32, -bound, bound)
    # TODO(synk): custom LayerNorm / Affine class defs not provided; standard inits
    # assumed: norm gamma=1 / beta=0; Affine init_gamma=0.1 / init_beta=1 as in ctor.
    return dict(
        ng=jnp.ones((P, N), jnp.float32),
        nb=jnp.zeros((P, N), jnp.float32),
        ag=jnp.full((P, N), 0.1, jnp.float32),
        ab=jnp.full((P, N), 1.0, jnp.float32),
        w_h2h=w_h2h,                                    # fused [N, 2N]
        w_x2h=w_x2h,
        lnx_b=-jnp.log(jax.random.uniform(k_lnb, (N,), jnp.float32,
                                          1.0, float(Tmax) - 1.0)),
    )


def pack_params(params, *, weight_dtype=jnp.bfloat16):
    """Pad / pack weights & per-pathway params ONCE (hoisted out of the forward)."""
    P, N = params['ng'].shape
    Np = _round_up(N, LANE)
    dn = Np - N

    pad_pn = lambda a: jnp.pad(a.astype(jnp.float32), ((0, 0), (0, dn)))
    pp = jnp.stack([
        pad_pn(params['ng']),
        pad_pn(params['nb']),
        pad_pn(params['ag']),
        pad_pn(params['ab']),
        pad_pn(jnp.broadcast_to(params['lnx_b'][None, :], (P, N))),
    ], axis=0)                                                   # [5, P, Np]

    # TODO(synk): on v7x, fp8 weights (with per-tensor scales) would give ~2x MXU
    # throughput in the large-Np regime; kept bf16 here for portability.
    wh = params['w_h2h'].astype(weight_dtype)                    # [N, 2N] = [whi|whg]
    whi = jnp.pad(wh[:, :N], ((0, dn), (0, dn)))
    whg = jnp.pad(wh[:, N:], ((0, dn), (0, dn)))
    wh_p = jnp.concatenate([whi, whg], axis=1)                   # [Np, 2Np]
    wx_p = jnp.pad(params['w_x2h'].astype(weight_dtype), ((0, dn), (0, dn)))
    return dict(pp=pp, wh=wh_p, wx=wx_p)


@functools.partial(jax.jit, static_argnames=("block_b",))
def layer_forward(xs_list, init_h, packed, *, block_b=512):
    """xs_list: P tensors of [B, N, T]; init_h: [B, N]; packed: pack_params(...).

    Returns [B, N, 1] (== torch.stack(hiddens[1:], dim=2)).
    """
    # Slice the last time step BEFORE stacking: avoids materializing [B,P,N,T].
    xx = jnp.stack([x[..., -1] for x in xs_list], axis=1).astype(jnp.float32)  # [B,P,N]
    B, P, N = xx.shape
    Np = packed['wx'].shape[0]
    dn = Np - N
    wbytes = jnp.dtype(packed['wh'].dtype).itemsize

    hx = init_h.astype(jnp.float32)
    if dn:
        xx = jnp.pad(xx, ((0, 0), (0, 0), (0, dn)))
        hx = jnp.pad(hx, ((0, 0), (0, dn)))

    # ---- batch tile selection: multiple of 8, >=2 grid steps when possible
    # (megacore on 2-TC chips), shrunk to fit ~80% of per-core VMEM.
    vmem_budget = _vmem_budget_bytes()

    def vmem_need(tb):
        act_io = 2 * 4 * tb * (P * Np + 2 * Np)           # xx/hx/out, double-buffered
        consts = 4 * 5 * P * Np + wbytes * 3 * Np * Np    # pp + wh + wx, single-buffered
        temps = 4 * tb * (4 * P * Np + 8 * Np)            # in-kernel f32 intermediates
        return act_io + consts + temps + (8 << 20)

    B8 = _round_up(B, 8)
    TB = max(8, _round_up(min(block_b, B8), 8))
    if _round_up(B8, TB) // TB < 2 and B8 >= 16:
        TB = _round_up((B8 + 1) // 2, 8)                  # >=2 steps for 2 TensorCores
    while TB > 8 and vmem_need(TB) > vmem_budget:
        TB = max(8, _round_up(TB // 2, 8))
    vmem_limit = int(min(max(vmem_need(TB), 32 << 20), vmem_budget))

    Bp = _round_up(B, TB)
    if Bp != B:
        xx = jnp.pad(xx, ((0, Bp - B), (0, 0), (0, 0)))
        hx = jnp.pad(hx, ((0, Bp - B), (0, 0)))
    grid = (Bp // TB,)

    kernel = functools.partial(layer_kernel, n_actual=N)
    h = pl.pallas_call(
        kernel,
        out_shape=jax.ShapeDtypeStruct((Bp, Np), jnp.float32),
        grid=grid,
        in_specs=[
            pl.BlockSpec((TB, P, Np), lambda i: (i, 0, 0)),                     # xx tile
            pl.BlockSpec((TB, Np), lambda i: (i, 0)),                           # hx tile
            pl.BlockSpec((5, P, Np), lambda i: (0, 0, 0),
                         pipeline_mode=pl.Buffered(1)),                         # params
            pl.BlockSpec((Np, 2 * Np), lambda i: (0, 0),
                         pipeline_mode=pl.Buffered(1)),                         # w_h2h
            pl.BlockSpec((Np, Np), lambda i: (0, 0),
                         pipeline_mode=pl.Buffered(1)),                         # w_x2h
        ],
        out_specs=pl.BlockSpec((TB, Np), lambda i: (i, 0)),
        compiler_params=pltpu.CompilerParams(
            dimension_semantics=("parallel",),
            vmem_limit_bytes=vmem_limit),
    )(xx, hx, packed['pp'], packed['wh'], packed['wx'])

    # torch.stack(hiddens[1:], dim=2) -> [B, N, 1]
    return h[:B, :N, None]


def layer_forward_ref(xs_list, init_h, params):
    """Pure-JAX reference mirroring the PyTorch forward exactly (f32, unpadded)."""
    xs = jnp.stack(xs_list, axis=1)                                # [B, P, N, T]
    mu = xs.mean(axis=2, keepdims=True)
    var = ((xs - mu) ** 2).mean(axis=2, keepdims=True)
    xs_n = ((xs - mu) / jnp.sqrt(var + EPS)
            * params['ng'][None, :, :, None] + params['nb'][None, :, :, None])
    xx = xs_n[..., -1]
    hx = init_h
    g = jax.nn.sigmoid(hx[:, None, :] * params['ag'] + params['ab'])
    in_layer = jnp.maximum((g * xx).sum(1), 0.0)
    N = hx.shape[-1]
    h2h = hx @ params['w_h2h']
    m2 = h2h.mean(-1, keepdims=True)
    v2 = ((h2h - m2) ** 2).mean(-1, keepdims=True)
    h2h = (h2h - m2) / jnp.sqrt(v2 + EPS) * 0.1
    h_i, h_g = h2h[:, :N], h2h[:, N:]
    x = jnp.maximum(in_layer + h_i, 0.0)
    x2h = x @ params['w_x2h']
    m3 = x2h.mean(-1, keepdims=True)
    v3 = ((x2h - m3) ** 2).mean(-1, keepdims=True)
    x2h = (x2h - m3) / jnp.sqrt(v3 + EPS) * 0.1 + params['lnx_b'][None, :]
    gg = jax.nn.sigmoid(x2h + h_g)
    h = (1.0 - gg) * hx + gg * x
    return h[:, :, None]


if __name__ == "__main__":
    B, P, N, T, Tmax = 2, 4, 32, 8, 10
    key = jax.random.PRNGKey(0)
    k_xs, k_h, k_p = jax.random.split(key, 3)
    xs_keys = jax.random.split(k_xs, P)
    xs_list = [jax.random.normal(kk, (B, N, T), jnp.float32) for kk in xs_keys]
    init_h = jax.random.normal(k_h, (B, N), jnp.float32)
    params = make_params(k_p, P, N, Tmax)

    ref = layer_forward_ref(xs_list, init_h, params)

    # --- f32 matmul path (tight numerical check vs. reference) ---
    packed_f32 = pack_params(params, weight_dtype=jnp.float32)
    out = jax.block_until_ready(layer_forward(xs_list, init_h, packed_f32))
    assert out.shape == (B, N, 1), out.shape
    assert jnp.allclose(out, ref, atol=1e-4, rtol=1e-4), \
        f"f32 max abs diff {jnp.max(jnp.abs(out - ref))}"

    # --- default bf16 matmul path (MXU fast path; f32 accumulation / elementwise) ---
    packed_bf16 = pack_params(params)
    out_bf = jax.block_until_ready(layer_forward(xs_list, init_h, packed_bf16))
    assert jnp.allclose(out_bf, ref, atol=5e-2, rtol=5e-2), \
        f"bf16 max abs diff {jnp.max(jnp.abs(out_bf - ref))}"

    # --- multi-block batch grid (exercise tiling + batch padding + megacore split) ---
    B2 = 20
    k_xs2, k_h2 = jax.random.split(jax.random.PRNGKey(1))
    xs_keys2 = jax.random.split(k_xs2, P)
    xs_list2 = [jax.random.normal(kk, (B2, N, T), jnp.float32) for kk in xs_keys2]
    init_h2 = jax.random.normal(k_h2, (B2, N), jnp.float32)
    out2 = jax.block_until_ready(
        layer_forward(xs_list2, init_h2, packed_f32, block_b=8))
    ref2 = layer_forward_ref(xs_list2, init_h2, params)
    assert out2.shape == (B2, N, 1), out2.shape
    assert jnp.allclose(out2, ref2, atol=1e-4, rtol=1e-4), \
        f"grid max abs diff {jnp.max(jnp.abs(out2 - ref2))}"

    print("KERNEL_OK")
</pallas_src>

<mosaic_0001>
module attributes {stable_mosaic.version = 11 : i64} {
  func.func @layer_kernel(%arg0: i32, %arg1: memref<8x4x128xf32, #tpu.memory_space<vmem>>, %arg2: memref<8x128xf32, #tpu.memory_space<vmem>>, %arg3: memref<5x4x128xf32, #tpu.memory_space<vmem>>, %arg4: memref<128x256xf32, #tpu.memory_space<vmem>>, %arg5: memref<128x128xf32, #tpu.memory_space<vmem>>, %arg6: memref<8x128xf32, #tpu.memory_space<vmem>>) attributes {dimension_semantics = [#tpu.dimension_semantics<parallel>], iteration_bounds = array<i64: 1>, scalar_prefetch = 0 : i64, scratch_operands = 0 : i64, tpu.core_type = #tpu.core_type<tc>, window_params = [{transform_indices = @transform_0, window_bounds = array<i64: 8, 4, 128>}, {transform_indices = @transform_1, window_bounds = array<i64: 8, 128>}, {pipeline_mode = #tpu.pipeline_mode<synchronous>, transform_indices = @transform_2, window_bounds = array<i64: 5, 4, 128>}, {pipeline_mode = #tpu.pipeline_mode<synchronous>, transform_indices = @transform_3, window_bounds = array<i64: 128, 256>}, {pipeline_mode = #tpu.pipeline_mode<synchronous>, transform_indices = @transform_4, window_bounds = array<i64: 128, 128>}, {transform_indices = @transform_5, window_bounds = array<i64: 8, 128>}]} {
    %c0 = arith.constant 0 : index
    %c0_0 = arith.constant 0 : index
    %c0_1 = arith.constant 0 : index
    %0 = vector.load %arg1[%c0, %c0_0, %c0_1] : memref<8x4x128xf32, #tpu.memory_space<vmem>>, vector<8x4x128xf32>
    %c0_2 = arith.constant 0 : index
    %c0_3 = arith.constant 0 : index
    %1 = vector.load %arg2[%c0_2, %c0_3] : memref<8x128xf32, #tpu.memory_space<vmem>>, vector<8x128xf32>
    %c0_4 = arith.constant 0 : index
    %c0_5 = arith.constant 0 : index
    %c0_6 = arith.constant 0 : index
    %2 = vector.load %arg3[%c0_4, %c0_5, %c0_6] : memref<5x4x128xf32, #tpu.memory_space<vmem>>, vector<1x4x128xf32>
    %3 = vector.shape_cast %2 : vector<1x4x128xf32> to vector<4x128xf32>
    %4 = vector.shape_cast %3 : vector<4x128xf32> to vector<1x4x128xf32>
    %c1 = arith.constant 1 : index
    %c0_7 = arith.constant 0 : index
    %c0_8 = arith.constant 0 : index
    %5 = vector.load %arg3[%c1, %c0_7, %c0_8] : memref<5x4x128xf32, #tpu.memory_space<vmem>>, vector<1x4x128xf32>
    %6 = vector.shape_cast %5 : vector<1x4x128xf32> to vector<4x128xf32>
    %7 = vector.shape_cast %6 : vector<4x128xf32> to vector<1x4x128xf32>
    %c2 = arith.constant 2 : index
    %c0_9 = arith.constant 0 : index
    %c0_10 = arith.constant 0 : index
    %8 = vector.load %arg3[%c2, %c0_9, %c0_10] : memref<5x4x128xf32, #tpu.memory_space<vmem>>, vector<1x4x128xf32>
    %9 = vector.shape_cast %8 : vector<1x4x128xf32> to vector<4x128xf32>
    %10 = vector.shape_cast %9 : vector<4x128xf32> to vector<1x4x128xf32>
    %c3 = arith.constant 3 : index
    %c0_11 = arith.constant 0 : index
    %c0_12 = arith.constant 0 : index
    %11 = vector.load %arg3[%c3, %c0_11, %c0_12] : memref<5x4x128xf32, #tpu.memory_space<vmem>>, vector<1x4x128xf32>
    %12 = vector.shape_cast %11 : vector<1x4x128xf32> to vector<4x128xf32>
    %13 = vector.shape_cast %12 : vector<4x128xf32> to vector<1x4x128xf32>
    %c4 = arith.constant 4 : index
    %c0_13 = arith.constant 0 : index
    %c0_14 = arith.constant 0 : index
    %14 = vector.load %arg3[%c4, %c0_13, %c0_14] : memref<5x4x128xf32, #tpu.memory_space<vmem>>, vector<1x4x128xf32>
    %15 = vector.shape_cast %14 : vector<1x4x128xf32> to vector<4x128xf32>
    %16 = vector.extract_strided_slice %15 {offsets = [0, 0], sizes = [1, 128], strides = [1, 1]} : vector<4x128xf32> to vector<1x128xf32>
    %cst = arith.constant dense<0.000000e+00> : vector<8x4xf32>
    %17 = vector.multi_reduction <add>, %0, %cst [2] : vector<8x4x128xf32> to vector<8x4xf32>
    %18 = vector.shape_cast %17 : vector<8x4xf32> to vector<8x4x1xf32>
    %19 = arith.mulf %0, %0 : vector<8x4x128xf32>
    %cst_15 = arith.constant dense<0.000000e+00> : vector<8x4xf32>
    %20 = vector.multi_reduction <add>, %19, %cst_15 [2] : vector<8x4x128xf32> to vector<8x4xf32>
    %21 = vector.shape_cast %20 : vector<8x4xf32> to vector<8x4x1xf32>
    %cst_16 = arith.constant 3.125000e-02 : f32
    %22 = vector.broadcast %cst_16 : f32 to vector<8x4x1xf32>
    %23 = arith.mulf %18, %22 : vector<8x4x1xf32>
    %cst_17 = arith.constant 3.125000e-02 : f32
    %24 = vector.broadcast %cst_17 : f32 to vector<8x4x1xf32>
    %25 = arith.mulf %21, %24 : vector<8x4x1xf32>
    %26 = arith.mulf %23, %23 : vector<8x4x1xf32>
    %27 = arith.subf %25, %26 : vector<8x4x1xf32>
    %cst_18 = arith.constant 0.000000e+00 : f32
    %28 = vector.broadcast %cst_18 : f32 to vector<8x4x1xf32>
    %29 = arith.maximumf %27, %28 : vector<8x4x1xf32>
    %30 = vector.broadcast %23 : vector<8x4x1xf32> to vector<8x4x128xf32>
    %31 = arith.subf %0, %30 : vector<8x4x128xf32>
    %cst_19 = arith.constant 9.99999974E-6 : f32
    %32 = vector.broadcast %cst_19 : f32 to vector<8x4x1xf32>
    %33 = arith.addf %29, %32 : vector<8x4x1xf32>
    %34 = math.rsqrt %33 : vector<8x4x1xf32>
    %35 = vector.broadcast %34 : vector<8x4x1xf32> to vector<8x4x128xf32>
    %36 = arith.mulf %31, %35 : vector<8x4x128xf32>
    %37 = vector.broadcast %4 : vector<1x4x128xf32> to vector<8x4x128xf32>
    %38 = arith.mulf %36, %37 : vector<8x4x128xf32>
    %39 = vector.broadcast %7 : vector<1x4x128xf32> to vector<8x4x128xf32>
    %40 = arith.addf %38, %39 : vector<8x4x128xf32>
    %41 = vector.shape_cast %1 : vector<8x128xf32> to vector<8x1x128xf32>
    %42 = vector.broadcast %41 : vector<8x1x128xf32> to vector<8x4x128xf32>
    %43 = vector.broadcast %10 : vector<1x4x128xf32> to vector<8x4x128xf32>
    %44 = arith.mulf %42, %43 : vector<8x4x128xf32>
    %45 = vector.broadcast %13 : vector<1x4x128xf32> to vector<8x4x128xf32>
    %46 = arith.addf %44, %45 : vector<8x4x128xf32>
    %cst_20 = arith.constant 5.000000e-01 : f32
    %47 = vector.broadcast %cst_20 : f32 to vector<8x4x128xf32>
    %48 = arith.mulf %47, %46 : vector<8x4x128xf32>
    %49 = math.tanh %48 : vector<8x4x128xf32>
    %cst_21 = arith.constant 5.000000e-01 : f32
    %50 = vector.broadcast %cst_21 : f32 to vector<8x4x128xf32>
    %51 = arith.mulf %50, %49 : vector<8x4x128xf32>
    %cst_22 = arith.constant 5.000000e-01 : f32
    %52 = vector.broadcast %cst_22 : f32 to vector<8x4x128xf32>
    %53 = arith.addf %51, %52 : vector<8x4x128xf32>
    %54 = arith.mulf %53, %40 : vector<8x4x128xf32>
    %cst_23 = arith.constant dense<0.000000e+00> : vector<8x128xf32>
    %55 = vector.multi_reduction <add>, %54, %cst_23 [1] : vector<8x4x128xf32> to vector<8x128xf32>
    %cst_24 = arith.constant 0.000000e+00 : f32
    %56 = vector.broadcast %cst_24 : f32 to vector<8x128xf32>
    %57 = arith.maximumf %55, %56 : vector<8x128xf32>
    %c0_25 = arith.constant 0 : index
    %c0_26 = arith.constant 0 : index
    %58 = vector.load %arg4[%c0_25, %c0_26] : memref<128x256xf32, #tpu.memory_space<vmem>>, vector<128x256xf32>
    %cst_27 = arith.constant dense<0.000000e+00> : vector<8x256xf32>
    %59 = tpu.matmul %1, %58, %cst_27 {dimension_numbers = #tpu.dot_dimension_numbers<[1], [0], [0], [1], [0, 0, 1, 1], [], []>} : vector<8x128xf32>, vector<128x256xf32>, vector<8x256xf32> -> vector<8x256xf32>
    %cst_28 = arith.constant dense<0.000000e+00> : vector<8xf32>
    %60 = vector.multi_reduction <add>, %59, %cst_28 [1] : vector<8x256xf32> to vector<8xf32>
    %61 = vector.shape_cast %60 : vector<8xf32> to vector<8x1xf32>
    %62 = arith.mulf %59, %59 : vector<8x256xf32>
    %cst_29 = arith.constant dense<0.000000e+00> : vector<8xf32>
    %63 = vector.multi_reduction <add>, %62, %cst_29 [1] : vector<8x256xf32> to vector<8xf32>
    %64 = vector.shape_cast %63 : vector<8xf32> to vector<8x1xf32>
    %cst_30 = arith.constant 1.562500e-02 : f32
    %65 = vector.broadcast %cst_30 : f32 to vector<8x1xf32>
    %66 = arith.mulf %61, %65 : vector<8x1xf32>
    %cst_31 = arith.constant 1.562500e-02 : f32
    %67 = vector.broadcast %cst_31 : f32 to vector<8x1xf32>
    %68 = arith.mulf %64, %67 : vector<8x1xf32>
    %69 = arith.mulf %66, %66 : vector<8x1xf32>
    %70 = arith.subf %68, %69 : vector<8x1xf32>
    %cst_32 = arith.constant 0.000000e+00 : f32
    %71 = vector.broadcast %cst_32 : f32 to vector<8x1xf32>
    %72 = arith.maximumf %70, %71 : vector<8x1xf32>
    %73 = vector.broadcast %66 : vector<8x1xf32> to vector<8x256xf32>
    %74 = arith.subf %59, %73 : vector<8x256xf32>
    %cst_33 = arith.constant 9.99999974E-6 : f32
    %75 = vector.broadcast %cst_33 : f32 to vector<8x1xf32>
    %76 = arith.addf %72, %75 : vector<8x1xf32>
    %77 = math.rsqrt %76 : vector<8x1xf32>
    %cst_34 = arith.constant 1.000000e-01 : f32
    %78 = vector.broadcast %cst_34 : f32 to vector<8x1xf32>
    %79 = arith.mulf %77, %78 : vector<8x1xf32>
    %80 = vector.broadcast %79 : vector<8x1xf32> to vector<8x256xf32>
    %81 = arith.mulf %74, %80 : vector<8x256xf32>
    %82 = vector.extract_strided_slice %81 {offsets = [0, 0], sizes = [8, 128], strides = [1, 1]} : vector<8x256xf32> to vector<8x128xf32>
    %83 = vector.extract_strided_slice %81 {offsets = [0, 128], sizes = [8, 128], strides = [1, 1]} : vector<8x256xf32> to vector<8x128xf32>
    %84 = arith.addf %57, %82 : vector<8x128xf32>
    %cst_35 = arith.constant 0.000000e+00 : f32
    %85 = vector.broadcast %cst_35 : f32 to vector<8x128xf32>
    %86 = arith.maximumf %84, %85 : vector<8x128xf32>
    %c0_36 = arith.constant 0 : index
    %c0_37 = arith.constant 0 : index
    %87 = vector.load %arg5[%c0_36, %c0_37] : memref<128x128xf32, #tpu.memory_space<vmem>>, vector<128x128xf32>
    %cst_38 = arith.constant dense<0.000000e+00> : vector<8x128xf32>
    %88 = tpu.matmul %86, %87, %cst_38 {dimension_numbers = #tpu.dot_dimension_numbers<[1], [0], [0], [1], [0, 0, 1, 1], [], []>} : vector<8x128xf32>, vector<128x128xf32>, vector<8x128xf32> -> vector<8x128xf32>
    %cst_39 = arith.constant dense<0.000000e+00> : vector<8xf32>
    %89 = vector.multi_reduction <add>, %88, %cst_39 [1] : vector<8x128xf32> to vector<8xf32>
    %90 = vector.shape_cast %89 : vector<8xf32> to vector<8x1xf32>
    %91 = arith.mulf %88, %88 : vector<8x128xf32>
    %cst_40 = arith.constant dense<0.000000e+00> : vector<8xf32>
    %92 = vector.multi_reduction <add>, %91, %cst_40 [1] : vector<8x128xf32> to vector<8xf32>
    %93 = vector.shape_cast %92 : vector<8xf32> to vector<8x1xf32>
    %cst_41 = arith.constant 3.125000e-02 : f32
    %94 = vector.broadcast %cst_41 : f32 to vector<8x1xf32>
    %95 = arith.mulf %90, %94 : vector<8x1xf32>
    %cst_42 = arith.constant 3.125000e-02 : f32
    %96 = vector.broadcast %cst_42 : f32 to vector<8x1xf32>
    %97 = arith.mulf %93, %96 : vector<8x1xf32>
    %98 = arith.mulf %95, %95 : vector<8x1xf32>
    %99 = arith.subf %97, %98 : vector<8x1xf32>
    %cst_43 = arith.constant 0.000000e+00 : f32
    %100 = vector.broadcast %cst_43 : f32 to vector<8x1xf32>
    %101 = arith.maximumf %99, %100 : vector<8x1xf32>
    %102 = vector.broadcast %95 : vector<8x1xf32> to vector<8x128xf32>
    %103 = arith.subf %88, %102 : vector<8x128xf32>
    %cst_44 = arith.constant 9.99999974E-6 : f32
    %104 = vector.broadcast %cst_44 : f32 to vector<8x1xf32>
    %105 = arith.addf %101, %104 : vector<8x1xf32>
    %106 = math.rsqrt %105 : vector<8x1xf32>
    %cst_45 = arith.constant 1.000000e-01 : f32
    %107 = vector.broadcast %cst_45 : f32 to vector<8x1xf32>
    %108 = arith.mulf %106, %107 : vector<8x1xf32>
    %109 = vector.broadcast %108 : vector<8x1xf32> to vector<8x128xf32>
    %110 = arith.mulf %103, %109 : vector<8x128xf32>
    %111 = vector.broadcast %16 : vector<1x128xf32> to vector<8x128xf32>
    %112 = arith.addf %110, %111 : vector<8x128xf32>
    %113 = arith.addf %112, %83 : vector<8x128xf32>
    %cst_46 = arith.constant 5.000000e-01 : f32
    %114 = vector.broadcast %cst_46 : f32 to vector<8x128xf32>
    %115 = arith.mulf %114, %113 : vector<8x128xf32>
    %116 = math.tanh %115 : vector<8x128xf32>
    %cst_47 = arith.constant 5.000000e-01 : f32
    %117 = vector.broadcast %cst_47 : f32 to vector<8x128xf32>
    %118 = arith.mulf %117, %116 : vector<8x128xf32>
    %cst_48 = arith.constant 5.000000e-01 : f32
    %119 = vector.broadcast %cst_48 : f32 to vector<8x128xf32>
    %120 = arith.addf %118, %119 : vector<8x128xf32>
    %cst_49 = arith.constant 1.000000e+00 : f32
    %121 = vector.broadcast %cst_49 : f32 to vector<8x128xf32>
    %122 = arith.subf %121, %120 : vector<8x128xf32>
    %123 = arith.mulf %122, %1 : vector<8x128xf32>
    %124 = arith.mulf %120, %86 : vector<8x128xf32>
    %125 = arith.addf %123, %124 : vector<8x128xf32>
    %c0_50 = arith.constant 0 : index
    %c0_51 = arith.constant 0 : index
    %126 = vector.load %arg6[%c0_50, %c0_51] : memref<8x128xf32, #tpu.memory_space<vmem>>, vector<8x128xf32>
    tpu.vector_store %arg6[%c0_50, %c0_51], %125 {strides = array<i32>} : memref<8x128xf32, #tpu.memory_space<vmem>>, vector<8x128xf32>,
    return
  }
  func.func @transform_0(%arg0: i32) -> (i32, i32, i32) {
    %c0_i32 = arith.constant 0 : i32
    %c0_i32_0 = arith.constant 0 : i32
    %c0_i32_1 = arith.constant 0 : i32
    return %arg0, %c0_i32, %c0_i32_0 : i32, i32, i32
  }
  func.func @transform_1(%arg0: i32) -> (i32, i32) {
    %c0_i32 = arith.constant 0 : i32
    %c0_i32_0 = arith.constant 0 : i32
    return %arg0, %c0_i32 : i32, i32
  }
  func.func @transform_2(%arg0: i32) -> (i32, i32, i32) {
    %c0_i32 = arith.constant 0 : i32
    %c0_i32_0 = arith.constant 0 : i32
    %c0_i32_1 = arith.constant 0 : i32
    %c0_i32_2 = arith.constant 0 : i32
    return %c0_i32, %c0_i32_0, %c0_i32_1 : i32, i32, i32
  }
  func.func @transform_3(%arg0: i32) -> (i32, i32) {
    %c0_i32 = arith.constant 0 : i32
    %c0_i32_0 = arith.constant 0 : i32
    %c0_i32_1 = arith.constant 0 : i32
    return %c0_i32, %c0_i32_0 : i32, i32
  }
  func.func @transform_4(%arg0: i32) -> (i32, i32) {
    %c0_i32 = arith.constant 0 : i32
    %c0_i32_0 = arith.constant 0 : i32
    %c0_i32_1 = arith.constant 0 : i32
    return %c0_i32, %c0_i32_0 : i32, i32
  }
  func.func @transform_5(%arg0: i32) -> (i32, i32) {
    %c0_i32 = arith.constant 0 : i32
    %c0_i32_0 = arith.constant 0 : i32
    return %arg0, %c0_i32 : i32, i32
  }
}

</mosaic_0001>

<bundles_post_ra>
// kernel: layer_forward.1
= control target key start
LH: loop header
LB: loop body
LE: loop exit
PB: predicated region body
PF: predicated region fallthrough
CT: control target
= control target key end

     0   :  { %10 = vsyncpa [#allocation3], 0  ;;  %s1223_s0 = inlined_call_operand.vmem [shape: f32[8,4,128], index: 0, kind: input, shape index: {}]   ;;  %s1224_s1 = inlined_call_operand.vmem [shape: f32[8,128], index: 1, kind: input, shape index: {}]   ;;  %s1225_s2 = inlined_call_operand.vmem [shape: f32[5,4,128], index: 2, kind: input, shape index: {}]   ;;  %s1226_s3 = inlined_call_operand.hbm [shape: f32[128,256], index: 3, kind: input, shape index: {}]   ;;  %s1227_s4 = inlined_call_operand.hbm [shape: f32[128,128], index: 4, kind: input, shape index: {}]   ;;  %s1228_s5 = inlined_call_operand.vmem [shape: f32[8,128], index: 5, kind: output, shape index: {}]  }
   0x1   :  { %11 = vsyncpa [#allocation5], 0  ;;  %s937_s18 = smov [#allocation2]   ;;  %s889_s22 = scalar_lea.hbm %s1226_s3, 4096 }
   0x2   :  { %s23_s19 = sshll.u32 %s937_s18, 4  ;;  %p890_p0 = scmp.ne.s32.totalorder %s1226_s3, %s889_s22  ;;  %s24_s19 = int_to_ptr.vmem [resolvable:$true] %s23_s19 }
   0x3   :  { %p893_p1 = scmp.lt.u32.totalorder %s889_s22, %s1226_s3 }
   0x5   :  { %p895_p2 = pnand %p893_p1, %p890_p0 }
   0x7   :  { %898 = shalt.err (!%p895_p2)
}
   0x8   :  { %s899_s27 = scalar_lea.vmem %s24_s19, 4096  ;;  %p904_p4 = scmp.lt.s32.totalorder %s24_s19, %s24_s19 }
   0x9   :  { %p900_p3 = scmp.ne.s32.totalorder %s24_s19, %s899_s27  ;;  %p905_p5 = scmp.lt.s32.totalorder %s899_s27, %s899_s27 }
   0xb   :  { %p906_p6 = por %p905_p5, %p904_p4 }
   0xd   :  { %p907_p7 = pnand %p906_p6, %p900_p3 }
   0xf   :  { %910 = shalt.err (!%p907_p7)
}
  0x10   :  { %s938_s28 = smov 256   ;;  %s939_s29 = smov 16  }
  0x11   :  { %29 = dma.hbm_to_vmem [thread:$0]  %s1226_s3, 4096, %s24_s19, [#allocation3], %s938_s28, %s938_s28, %s939_s29  }
  0x12   :  { %s940_s7 = smov [#allocation4]   ;;  %s911_s11 = scalar_lea.hbm %s1227_s4, 2048 }
  0x13   :  { %s35_s8 = sshll.u32 %s940_s7, 4  ;;  %p912_p8 = scmp.ne.s32.totalorder %s1227_s4, %s911_s11  ;;  %s36_s8 = int_to_ptr.vmem [resolvable:$true] %s35_s8 }
  0x14   :  { %p915_p9 = scmp.lt.u32.totalorder %s911_s11, %s1227_s4 }
  0x16   :  { %p917_p10 = pnand %p915_p9, %p912_p8 }
  0x18   :  { %920 = shalt.err (!%p917_p10)
}
  0x19   :  { %s921_s16 = scalar_lea.vmem %s36_s8, 2048  ;;  %p926_p12 = scmp.lt.s32.totalorder %s36_s8, %s36_s8 }
  0x1a   :  { %p922_p11 = scmp.ne.s32.totalorder %s36_s8, %s921_s16  ;;  %p927_p13 = scmp.lt.s32.totalorder %s921_s16, %s921_s16 }
  0x1c   :  { %p928_p0 = por %p927_p13, %p926_p12 }
  0x1e   :  { %p929_p1 = pnand %p928_p0, %p922_p11 }
  0x20   :  { %932 = shalt.err (!%p929_p1)
}
  0x21   :  { %s941_s3 = smov 128   ;;  %s942_s17 = smov 8  }
  0x22   :  { %41 = dma.hbm_to_vmem [thread:$0]  %s1227_s4, 2048, %s36_s8, [#allocation5], %s941_s3, %s941_s3, %s942_s17  }
  0x23   :  { %933 = dma.done.wait [#allocation3], 4096  }
  0x24   :  { %934 = vsyncadd [#allocation3], 4294963200 }
  0x25   :  { %935 = dma.done.wait [#allocation5], 2048  }
  0x26   :  { %936 = vsyncadd [#allocation5], 4294965248  ;;  %v943_v0 = vmov 0.0   ;;  %v422_v1 = vld [vmem:[#allocation2 + $0x8] sm:$0xff]  ;;  %v424_v2 = vld [vmem:[#allocation2 + $0x18] sm:$0xff]  ;;  %vm66_vm0 = vcmask 1043456  }
  0x27   :  { %517 = vmatprep.mubr.f32.mxu0 %v943_v0  ;;  %v421_v3 = vld [vmem:[#allocation2] sm:$0xff]  ;;  %v784_v4 = vpack.c.bf16 %v424_v2, %v422_v1  ;;  %v423_v5 = vld [vmem:[#allocation2 + $0x10] sm:$0xff]  ;;  %v426_v6 = vld [vmem:[#allocation2 + $0x28] sm:$0xff]  ;;  %vm945_vm1 = vmmov 0   ;;  %vm601_vm2 = vcmask 1041409   ;;  %vm604_vm3 = vcmask 1042434  }
  0x28   :  { %v428_v7 = vld [vmem:[#allocation2 + $0x38] sm:$0xff]  ;;  %v786_v8 = vpack.c.bf16 %v423_v5, %v421_v3  ;;  %v425_v10 = vld [vmem:[#allocation2 + $0x20] sm:$0xff]  ;;  %v427_v11 = vld [vmem:[#allocation2 + $0x30] sm:$0xff]  ;;  %781 = vmatprep.mubr.msk.f32.mxu1 %vm945_vm1, %v943_v0  ;;  %vm607_vm4 = vcmask 1043459   ;;  %vm610_vm5 = vcmask 1044484   ;;  %vm613_vm6 = vcmask 1045509  }
  0x29   :  { %v788_v9 = vpack.c.bf16 %v428_v7, %v426_v6  ;;  %v430_v12 = vld [vmem:[#allocation2 + $0x48] sm:$0xff]  ;;  %785 = vmatprep.subr.bf16.mxu0 %v784_v4  ;;  %v432_v13 = vld [vmem:[#allocation2 + $0x58] sm:$0xff]  ;;  %v790_v14 = vpack.c.bf16 %v427_v11, %v425_v10  ;;  %v429_v16 = vld [vmem:[#allocation2 + $0x40] sm:$0xff]  ;;  %vm616_vm7 = vcmask 1046534   ;;  %vm619_vm8 = vcmask 1047559  }
  0x2a   :  { %787 = vmatpush1.bf16.msra.mxu0 %v786_v8  ;;  %v792_v15 = vpack.c.bf16 %v432_v13, %v430_v12  ;;  %v431_v17 = vld [vmem:[#allocation2 + $0x50] sm:$0xff]  ;;  %v434_v18 = vld [vmem:[#allocation2 + $0x68] sm:$0xff]  ;;  %v436_v19 = vld [vmem:[#allocation2 + $0x78] sm:$0xff] }
  0x2b   :  { %789 = vmatprep.subr.bf16.mxu0 %v788_v9  ;;  %v794_v20 = vpack.c.bf16 %v431_v17, %v429_v16  ;;  %v796_v21 = vpack.c.bf16 %v436_v19, %v434_v18  ;;  %v433_v22 = vld [vmem:[#allocation2 + $0x60] sm:$0xff]  ;;  %v435_v23 = vld [vmem:[#allocation2 + $0x70] sm:$0xff]  ;;  %v438_v24 = vld [vmem:[#allocation2 + $0x88] sm:$0xff] }
  0x2c   :  { %v440_v25 = vld [vmem:[#allocation2 + $0x98] sm:$0xff]  ;;  %v1005_v26 = vld [vmem:[%s1223_s0 + $0x4] sm:$0xf]  ;;  %v798_v27 = vpack.c.bf16 %v435_v23, %v433_v22  ;;  %v1017_v30 = vld [vmem:[%s1223_s0] sm:$0xf] }
  0x2d   :  { %v70_v28 = vsel %vm66_vm0, %v1005_v26, 0.0  ;;  %v1012_v29 = vld [vmem:[%s1223_s0 + $0x8] sm:$0xf]  ;;  %v800_v31 = vpack.c.bf16 %v440_v25, %v438_v24  ;;  %v437_v32 = vld [vmem:[#allocation2 + $0x80] sm:$0xff]  ;;  %v439_v33 = vld [vmem:[#allocation2 + $0x90] sm:$0xff]  ;;  %v67_v37 = vsel %vm66_vm0, %v1017_v30, 0.0  ;;  %v92_v39 = vmul.f32 %v1005_v26, %v1005_v26 }
  0x2e   :  { %791 = vmatpush1.bf16.msra.mxu0 %v790_v14  ;;  %71 = vadd.xlane.f32.xlu0 %v70_v28  ;;  %v1022_v34 = vld [vmem:[%s1223_s0 + $0xc] sm:$0xf]  ;;  %v442_v35 = vld [vmem:[#allocation2 + $0xa8] sm:$0xff]  ;;  %v73_v38 = vsel %vm66_vm0, %v1012_v29, 0.0  ;;  %v802_v40 = vpack.c.bf16 %v439_v33, %v437_v32  ;;  %v441_v43 = vld [vmem:[#allocation2 + $0xa0] sm:$0xff]  ;;  %v93_v49 = vmul.f32 %v1012_v29, %v1012_v29  ;;  %v91_v58 = vmul.f32 %v1017_v30, %v1017_v30 }
  0x2f   :  { %793 = vmatprep.subr.bf16.mxu0 %v792_v15  ;;  %v444_v36 = vld [vmem:[#allocation2 + $0xb8] sm:$0xff]  ;;  %68 = vadd.xlane.f32.xlu1 %v67_v37  ;;  %v76_v41 = vsel %vm66_vm0, %v1022_v34, 0.0  ;;  %v443_v44 = vld [vmem:[#allocation2 + $0xb0] sm:$0xff]  ;;  %v1035_v45 = vld [vmem:[%s1223_s0 + $0x10] sm:$0xf]  ;;  %v102_v48 = vsel %vm66_vm0, %v92_v39, 0.0  ;;  %v94_v2 = vmul.f32 %v1022_v34, %v1022_v34 }
  0x30   :  { %v804_v42 = vpack.c.bf16 %v444_v36, %v442_v35  ;;  %v446_v46 = vld [vmem:[#allocation2 + $0xc8] sm:$0xff]  ;;  %v448_v47 = vld [vmem:[#allocation2 + $0xd8] sm:$0xff]  ;;  %v806_v50 = vpack.c.bf16 %v443_v44, %v441_v43  ;;  %v79_v51 = vsel %vm66_vm0, %v1035_v45, 0.0  ;;  %v445_v53 = vld [vmem:[#allocation2 + $0xc0] sm:$0xff]  ;;  %v105_v57 = vsel %vm66_vm0, %v93_v49, 0.0 }
  0x31   :  { %v808_v52 = vpack.c.bf16 %v448_v47, %v446_v46  ;;  %v447_v54 = vld [vmem:[#allocation2 + $0xd0] sm:$0xff]  ;;  %v450_v55 = vld [vmem:[#allocation2 + $0xe8] sm:$0xff]  ;;  %v452_v56 = vld [vmem:[#allocation2 + $0xf8] sm:$0xff]  ;;  %v99_v3 = vsel %vm66_vm0, %v91_v58, 0.0  ;;  %v108_v5 = vsel %vm66_vm0, %v94_v2, 0.0  ;;  %v95_v6 = vmul.f32 %v1035_v45, %v1035_v45 }
  0x32   :  { %795 = vmatpush1.bf16.msra.mxu0 %v794_v20  ;;  %74 = vadd.xlane.f32.xlu0 %v73_v38  ;;  %v1048_v59 = vld [vmem:[%s1223_s0 + $0x14] sm:$0xf]  ;;  %v810_v60 = vpack.c.bf16 %v447_v54, %v445_v53  ;;  %v812_v61 = vpack.c.bf16 %v452_v56, %v450_v55  ;;  %v451_v63 = vld [vmem:[#allocation2 + $0xf0] sm:$0xff]  ;;  %v1061_v7 = vld [vmem:[%s1223_s0 + $0x18] sm:$0xf] }
  0x33   :  { %797 = vmatprep.subr.bf16.mxu0 %v796_v21  ;;  %77 = vadd.xlane.f32.xlu1 %v76_v41  ;;  %v449_v62 = vld [vmem:[#allocation2 + $0xe0] sm:$0xff]  ;;  %v82_v1 = vsel %vm66_vm0, %v1048_v59, 0.0  ;;  %v85_v8 = vsel %vm66_vm0, %v1061_v7, 0.0  ;;  %v1068_v9 = vld [vmem:[%s1224_s1] sm:$0xff]  ;;  %v111_v10 = vsel %vm66_vm0, %v95_v6, 0.0  ;;  %v96_v11 = vmul.f32 %v1048_v59, %v1048_v59  ;;  %v579_v33 = vld [vmem:[#allocation4 + $0x18] sm:$0xff] }
  0x34   :  { %v814_v4 = vpack.c.bf16 %v451_v63, %v449_v62  ;;  %v1076_v12 = vld [vmem:[%s1223_s0 + $0x1c] sm:$0xf]  ;;  %v97_v14 = vmul.f32 %v1061_v7, %v1061_v7  ;;  %v576_v25 = vld [vmem:[#allocation4] sm:$0xff]  ;;  %v578_v32 = vld [vmem:[#allocation4 + $0x10] sm:$0xff] }
  0x35   :  { %v88_v13 = vsel %vm66_vm0, %v1076_v12, 0.0  ;;  %v114_v15 = vsel %vm66_vm0, %v96_v11, 0.0  ;;  %v98_v16 = vmul.f32 %v1076_v12, %v1076_v12  ;;  %v820_v35 = vpack.c.bf16 %v579_v33, %v578_v32  ;;  %v580_v36 = vld [vmem:[#allocation4 + $0x20] sm:$0xff]  ;;  %v581_v37 = vld [vmem:[#allocation4 + $0x28] sm:$0xff]  ;;  %v582_v39 = vld [vmem:[#allocation4 + $0x30] sm:$0xff] }
  0x36   :  { %799 = vmatpush1.bf16.msra.mxu0 %v798_v27  ;;  %103 = vadd.xlane.f32.xlu0 %v102_v48  ;;  %v117_v17 = vsel %vm66_vm0, %v97_v14, 0.0  ;;  %v577_v27 = vld [vmem:[#allocation4 + $0x8] sm:$0xff]  ;;  %v823_v38 = vpack.c.bf16 %v581_v37, %v580_v36  ;;  %v586_v46 = vld [vmem:[#allocation4 + $0x50] sm:$0xff]  ;;  %v587_v47 = vld [vmem:[#allocation4 + $0x58] sm:$0xff] }
  0x37   :  { %801 = vmatprep.subr.bf16.mxu0 %v800_v31  ;;  %80 = vadd.xlane.f32.xlu1 %v79_v51  ;;  %v120_v18 = vsel %vm66_vm0, %v98_v16, 0.0  ;;  %v817_v28 = vpack.c.bf16 %v577_v27, %v576_v25  ;;  %v944_v31 = vmov 0.0|0.0   ;;  %v585_v43 = vld [vmem:[#allocation4 + $0x48] sm:$0xff]  ;;  %v832_v48 = vpack.c.bf16 %v587_v47, %v586_v46  ;;  %v588_v49 = vld [vmem:[#allocation4 + $0x60] sm:$0xff]  ;;  %v591_v53 = vld [vmem:[#allocation4 + $0x78] sm:$0xff] }
  0x38   :  { %816 = vmatprep.subr.bf16.mxu1 %v944_v31  ;;  %v1108_v27 = vld [vmem:[%s1225_s2 + $0x8] sm:$0xf] }
  0x39   :  { %818 = vmatpush3.bf16.msra.mxu1 %v817_v28 }
  0x3a   :  { %803 = vmatpush1.bf16.msra.mxu0 %v802_v40  ;;  %106 = vadd.xlane.f32.xlu0 %v105_v57  ;;  %v583_v40 = vld [vmem:[#allocation4 + $0x38] sm:$0xff] }
  0x3b   :  { %805 = vmatprep.subr.bf16.mxu0 %v804_v42  ;;  %83 = vadd.xlane.f32.xlu1 %v82_v1  ;;  %v826_v41 = vpack.c.bf16 %v583_v40, %v582_v39  ;;  %v584_v42 = vld [vmem:[#allocation4 + $0x40] sm:$0xff] }
  0x3c   :  { %819 = vmatprep.subr.bf16.mxu1 %v944_v31  ;;  %v829_v44 = vpack.c.bf16 %v585_v43, %v584_v42 }
  0x3d   :  { %821 = vmatpush3.bf16.msra.mxu1 %v820_v35 }
  0x3e   :  { %807 = vmatpush1.bf16.msra.mxu0 %v806_v50  ;;  %100 = vadd.xlane.f32.xlu0 %v99_v3  ;;  %v589_v50 = vld [vmem:[#allocation4 + $0x68] sm:$0xff] }
  0x3f   :  { %809 = vmatprep.subr.bf16.mxu0 %v808_v52  ;;  %109 = vadd.xlane.f32.xlu1 %v108_v5  ;;  %v835_v51 = vpack.c.bf16 %v589_v50, %v588_v49  ;;  %v590_v52 = vld [vmem:[#allocation4 + $0x70] sm:$0xff]  ;;  %v1137_v49 = vld [vmem:[%s1225_s2 + $0xc] sm:$0xf] }
  0x40   :  { %822 = vmatprep.subr.bf16.mxu1 %v944_v31  ;;  %v838_v54 = vpack.c.bf16 %v591_v53, %v590_v52 }
  0x41   :  { %824 = vmatpush3.bf16.msra.mxu1 %v823_v38 }
  0x42   :  { %811 = vmatpush1.bf16.msra.mxu0 %v810_v60  ;;  %86 = vadd.xlane.f32.xlu0 %v85_v8  ;;  %v946_v60 = vmov 1966171168  }
  0x43   :  { %813 = vmatprep.subr.bf16.mxu0 %v812_v61  ;;  %112 = vadd.xlane.f32.xlu1 %v111_v10  ;;  %v214_v0 = vunpack.c.l.s4 %v946_v60  ;;  %v216_v61 = vlaneseq  ;;  %v212_v10 = vcombine.high %v1068_v9, %v1068_v9 }
  0x44   :  { %825 = vmatprep.subr.bf16.mxu1 %v944_v31 }
  0x45   :  { %827 = vmatpush3.bf16.msra.mxu1 %v826_v41  ;;  %v215_v1 = vunpack.c.0.s8 %v214_v0  ;;  %v217_v2 = vshrl.u32 %v216_v61, 7 }
  0x46   :  { %815 = vmatpush1.bf16.msra.mxu0 %v814_v4  ;;  %89 = vadd.xlane.f32.xlu0 %v88_v13 }
  0x47   :  { %115 = vadd.xlane.f32.xlu1 %v114_v15  ;;  %828 = vmatprep.subr.bf16.mxu1 %v944_v31  ;;  %v218_v3 = vsub.s32 %v215_v1, %v217_v2  ;;  %v1102_v15 = vsub.s32 0, %v217_v2 }
  0x49   :  { %518 = vmatmul.mubr.f32.vlgmr.msra.gmra.mrb[0].mxu0 %v1068_v9  ;;  %830 = vmatpush3.bf16.msra.mxu1 %v829_v44  ;;  %v219_v6 = vrot.slane %v1068_v9, %v218_v3 }
  0x4a   :  { %118 = vadd.xlane.f32.xlu0 %v117_v17  ;;  %831 = vmatprep.subr.bf16.mxu1 %v944_v31  ;;  %v226_v17 = vrot.slane %v212_v10, %v218_v3 }
  0x4b   :  { %121 = vadd.xlane.f32.xlu1 %v120_v18  ;;  %v227_v13 = vcombine.high %v219_v6, %v219_v6  ;;  %v235_v14 = vrot.slane %v219_v6, %v218_v3 }
  0x4d   :  { %833 = vmatpush3.bf16.msra.mxu1 %v832_v48  ;;  %v249_v18 = vrot.slane %v227_v13, %v218_v3  ;;  %v264_v25 = vrot.slane %v235_v14, %v1102_v15 }
  0x4e   :  { %834 = vmatprep.subr.bf16.mxu1 %v944_v31 }
  0x4f   :  { %v268_v32 = vrot.slane %v249_v18, %v1102_v15  ;;  %v301_v41 = vmul.f32 %v1108_v27, %v264_v25 }
  0x51   :  { %836 = vmatpush3.bf16.msra.mxu1 %v835_v51  ;;  %v302_v50 = vmul.f32 %v1108_v27, %v268_v32 }
  0x52   :  { %837 = vmatprep.subr.bf16.mxu1 %v944_v31  ;;  %v1112_v31 = vrot.slane %v226_v17, %v218_v3 }
  0x54   :  { %v258_v39 = vcombine.high %v1112_v31, %v1112_v31 }
  0x55   :  { %839 = vmatpush3.bf16.msra.mxu1 %v838_v54 }
  0xbb   :  { %v72_v55 = vpop.xlane.xlu0 %71 }
  0xbc   :  { %v69_v56 = vpop.xlane.xlu1 %68  ;;  %v1110_v28 = vmul.f32 0.03125, %v72_v55 }
  0xbd   :  { %v1120_v38 = vmul.f32 0.03125, %v69_v56 }
  0xbe   :  { %v140_v44 = vmul.f32 %v1110_v28, %v1110_v28 }
  0xbf   :  { %v75_v57 = vpop.xlane.xlu0 %74  ;;  %v139_v55 = vmul.f32 %v1120_v38, %v1120_v38 }
  0xc0   :  { %v78_v58 = vpop.xlane.xlu1 %77  ;;  %v1115_v33 = vmul.f32 0.03125, %v75_v57 }
  0xc1   :  { %v1126_v42 = vmul.f32 0.03125, %v78_v58 }
  0xc2   :  { %v141_v51 = vmul.f32 %v1115_v33, %v1115_v33 }
  0xc3   :  { %v104_v62 = vpop.xlane.xlu0 %103  ;;  %v142_v60 = vmul.f32 %v1126_v42, %v1126_v42 }
  0xc4   :  { %v81_v63 = vpop.xlane.xlu1 %80  ;;  %v132_v46 = vmul.f32 0.03125, %v104_v62 }
  0xc5   :  { %v1132_v47 = vmul.f32 0.03125, %v81_v63  ;;  %v309_v63 = vadd.f32 %v1137_v49, %v301_v41 }
  0xc6   :  { %v148_v1 = vsub.f32 %v132_v46, %v140_v44  ;;  %v288_v44 = vrot.slane %v258_v39, %v1102_v15 }
  0xc7   :  { %v107_v4 = vpop.xlane.xlu0 %106  ;;  %v143_v2 = vmul.f32 %v1132_v47, %v1132_v47 }
  0xc8   :  { %v84_v5 = vpop.xlane.xlu1 %83  ;;  %v133_v52 = vmul.f32 0.03125, %v107_v4  ;;  %v156_v25 = vmax.f32 %v148_v1, 0.0  ;;  %v307_v39 = vmul.f32 %v1108_v27, %v288_v44  ;;  %v165_v44 = vsub.f32 %v1012_v29, %v1115_v33  ;;  %v57_v29 = vld [vmem:[%s1225_s2] sm:$0xf] }
  0xc9   :  { %v1142_v53 = vmul.f32 0.03125, %v84_v5  ;;  %v310_v5 = vadd.f32 %v1137_v49, %v302_v50 }
  0xca   :  { %v149_v6 = vsub.f32 %v133_v52, %v141_v51 }
  0xcb   :  { %v101_v8 = vpop.xlane.xlu0 %100 }
  0xcc   :  { %v110_v11 = vpop.xlane.xlu1 %109  ;;  %v131_v56 = vmul.f32 0.03125, %v101_v8  ;;  %v144_v8 = vmul.f32 %v1142_v53, %v1142_v53 }
  0xcd   :  { %v134_v0 = vmul.f32 0.03125, %v110_v11 }
  0xce   :  { %v147_v13 = vsub.f32 %v131_v56, %v139_v55  ;;  %v172_v56 = vadd.f32 1e-05, %v156_v25 }
  0xcf   :  { %v87_v16 = vpop.xlane.xlu0 %86 }
  0xd0   :  { %v1147_v57 = vmul.f32 0.03125, %v87_v16 }
  0xd3   :  { %v90_v35 = vpop.xlane.xlu0 %89 }
  0xd4   :  { %v1152_v61 = vmul.f32 0.03125, %v90_v35 }
  0xd7   :  { %v119_v62 = vpop.xlane.xlu0 %118 }
  0xd8   :  { %v137_v16 = vmul.f32 0.03125, %v119_v62 }
 0x11c   :  { %v1088_v19 = vpop.f32.mrb[0].mxu0 }
 0x11d   :  { %v1090_v20 = vpop.f32.mrb[1].mxu0  ;;  %v527_v21 = vmul.f32 %v1088_v19, %v1088_v19 }
 0x11e   :  { %v528_v22 = vmul.f32 %v1090_v20, %v1090_v20  ;;  %v524_v23 = vadd.f32 %v1090_v20, %v1088_v19 }
 0x120   :  { %525 = vadd.xlane.f32.xlu0 %v524_v23  ;;  %v529_v24 = vadd.f32 %v528_v22, %v527_v21  ;;  %v228_v21 = vcombine.high %v226_v17, %v226_v17  ;;  %v257_v22 = vcombine.high %v235_v14, %v235_v14  ;;  %v113_v23 = vpop.xlane.xlu1 %112  ;;  %v145_v14 = vmul.f32 %v1147_v57, %v1147_v57 }
 0x122   :  { %530 = vadd.xlane.f32.xlu1 %v529_v24  ;;  %v259_v24 = vcombine.high %v249_v18, %v249_v18  ;;  %v1117_v36 = vrot.slane %v228_v21, %v218_v3  ;;  %v272_v37 = vrot.slane %v257_v22, %v1102_v15  ;;  %v135_v3 = vmul.f32 0.03125, %v113_v23 }
 0x123   :  { %v150_v18 = vsub.f32 %v134_v0, %v142_v60  ;;  %v146_v21 = vmul.f32 %v1152_v61, %v1152_v61  ;;  %v280_v23 = vrot.slane %v1112_v31, %v1102_v15  ;;  %v153_v50 = vsub.f32 %v137_v16, %v145_v14 }
 0x124   :  { %v276_v40 = vrot.slane %v259_v24, %v1102_v15  ;;  %v260_v43 = vcombine.high %v1117_v36, %v1117_v36  ;;  %v116_v48 = vpop.xlane.xlu1 %115  ;;  %v303_v54 = vmul.f32 %v1108_v27, %v272_v37  ;;  %v317_v24 = vmul.f32 0.5, %v309_v63 }
 0x125   :  { %v136_v10 = vmul.f32 0.03125, %v116_v48  ;;  %v151_v32 = vsub.f32 %v135_v3, %v143_v2  ;;  %v284_v35 = vrot.slane %v1117_v36, %v1102_v15  ;;  %v318_v37 = vmul.f32 0.5, %v310_v5 }
 0x126   :  { %v304_v58 = vmul.f32 %v1108_v27, %v276_v40  ;;  %v311_v11 = vadd.f32 %v1137_v49, %v303_v54  ;;  %v157_v40 = vmax.f32 %v149_v6, 0.0  ;;  %v155_v48 = vmax.f32 %v147_v13, 0.0 }
 0x127   :  { %v152_v41 = vsub.f32 %v136_v10, %v144_v8  ;;  %v292_v51 = vrot.slane %v260_v43, %v1102_v15  ;;  %v158_v54 = vmax.f32 %v150_v18, 0.0  ;;  %v305_v31 = vmul.f32 %v1108_v27, %v280_v23 }
 0x128   :  { %v122_v4 = vpop.xlane.xlu1 %121  ;;  %v312_v17 = vadd.f32 %v1137_v49, %v304_v58  ;;  %v319_v46 = vmul.f32 0.5, %v311_v11  ;;  %851 = vtanh.f32 %v317_v24  ;;  %v159_v58 = vmax.f32 %v151_v32, 0.0 }
 0x129   :  { %v138_v22 = vmul.f32 0.03125, %v122_v4  ;;  %v306_v36 = vmul.f32 %v1108_v27, %v284_v35  ;;  %853 = vtanh.f32 %v318_v37  ;;  %v173_v60 = vadd.f32 1e-05, %v157_v40 }
 0x12a   :  { %v320_v52 = vmul.f32 0.5, %v312_v17  ;;  %v160_v0 = vmax.f32 %v152_v41, 0.0  ;;  %855 = vtanh.f32 %v319_v46  ;;  %v171_v62 = vadd.f32 1e-05, %v155_v48 }
 0x12b   :  { %v154_v55 = vsub.f32 %v138_v22, %v146_v21  ;;  %v161_v63 = vmax.f32 %v153_v50, 0.0  ;;  %v308_v43 = vmul.f32 %v1108_v27, %v292_v51  ;;  %v174_v1 = vadd.f32 1e-05, %v158_v54 }
 0x12c   :  { %857 = vtanh.f32 %v320_v52  ;;  %v313_v3 = vadd.f32 %v1137_v49, %v305_v31  ;;  %v175_v4 = vadd.f32 1e-05, %v159_v58  ;;  %v314_v5 = vadd.f32 %v1137_v49, %v306_v36 }
 0x12d   :  { %v162_v2 = vmax.f32 %v154_v55, 0.0  ;;  %859 = vrsqrt.f32 %v172_v56  ;;  %v176_v6 = vadd.f32 1e-05, %v160_v0  ;;  %v315_v8 = vadd.f32 %v1137_v49, %v307_v39 }
 0x12e   :  { %861 = vrsqrt.f32 %v173_v60  ;;  %v177_v10 = vadd.f32 1e-05, %v161_v63  ;;  %v316_v11 = vadd.f32 %v1137_v49, %v308_v43  ;;  %v321_v27 = vmul.f32 0.5, %v313_v3  ;;  %v728_v60 = vld [vmem:[%s1225_s2 + $0x4] sm:$0xf] }
 0x12f   :  { %863 = vrsqrt.f32 %v171_v62  ;;  %v178_v13 = vadd.f32 1e-05, %v162_v2  ;;  %v322_v14 = vmul.f32 0.5, %v314_v5  ;;  %v323_v17 = vmul.f32 0.5, %v315_v8 }
 0x130   :  { %865 = vrsqrt.f32 %v174_v1  ;;  %v324_v21 = vmul.f32 0.5, %v316_v11  ;;  %v164_v35 = vsub.f32 %v1005_v26, %v1110_v28  ;;  %v163_v40 = vsub.f32 %v1017_v30, %v1120_v38 }
 0x131   :  { %867 = vrsqrt.f32 %v175_v4  ;;  %v166_v46 = vsub.f32 %v1022_v34, %v1126_v42  ;;  %v167_v48 = vsub.f32 %v1035_v45, %v1132_v47  ;;  %v168_v50 = vsub.f32 %v1048_v59, %v1142_v53 }
 0x132   :  { %869 = vrsqrt.f32 %v176_v6  ;;  %v852_v16 = vpop.eup %851  ;;  %v169_v26 = vsub.f32 %v1061_v7, %v1147_v57  ;;  %v170_v30 = vsub.f32 %v1076_v12, %v1152_v61 }
 0x133   :  { %871 = vrsqrt.f32 %v177_v10  ;;  %v854_v18 = vpop.eup %853  ;;  %v333_v57 = vmul.f32 0.5, %v852_v16 }
 0x134   :  { %873 = vrsqrt.f32 %v178_v13  ;;  %v856_v22 = vpop.eup %855  ;;  %v334_v31 = vmul.f32 0.5, %v854_v18 }
 0x135   :  { %875 = vtanh.f32 %v321_v27  ;;  %v335_v12 = vmul.f32 0.5, %v856_v22  ;;  %v341_v5 = vadd.f32 0.5, %v333_v57 }
 0x136   :  { %v858_v23 = vpop.eup %857  ;;  %877 = vtanh.f32 %v322_v14  ;;  %v342_v6 = vadd.f32 0.5, %v334_v31 }
 0x137   :  { %v860_v24 = vpop.eup %859  ;;  %879 = vtanh.f32 %v323_v17  ;;  %v336_v56 = vmul.f32 0.5, %v858_v23  ;;  %v343_v8 = vadd.f32 0.5, %v335_v12 }
 0x138   :  { %v862_v25 = vpop.eup %861  ;;  %881 = vtanh.f32 %v324_v21  ;;  %v188_v38 = vmul.f32 %v860_v24, %v164_v35 }
 0x139   :  { %v864_v49 = vpop.eup %863  ;;  %v189_v45 = vmul.f32 %v862_v25, %v165_v44  ;;  %v344_v27 = vadd.f32 0.5, %v336_v56 }
 0x13a   :  { %v866_v32 = vpop.eup %865  ;;  %v187_v34 = vmul.f32 %v864_v49, %v163_v40  ;;  %v196_v61 = vmul.f32 %v188_v38, %v57_v29 }
 0x13b   :  { %v868_v37 = vpop.eup %867  ;;  %v190_v42 = vmul.f32 %v866_v32, %v166_v46  ;;  %v197_v39 = vmul.f32 %v189_v45, %v57_v29 }
 0x13c   :  { %v870_v41 = vpop.eup %869  ;;  %v191_v47 = vmul.f32 %v868_v37, %v167_v48  ;;  %v195_v0 = vmul.f32 %v187_v34, %v57_v29  ;;  %v204_v10 = vadd.f32 %v728_v60, %v196_v61 }
 0x13d   :  { %v872_v51 = vpop.eup %871  ;;  %v192_v59 = vmul.f32 %v870_v41, %v168_v50  ;;  %v198_v62 = vmul.f32 %v190_v42, %v57_v29  ;;  %v205_v16 = vadd.f32 %v728_v60, %v197_v39 }
 0x13e   :  { %v874_v28 = vpop.eup %873  ;;  %v193_v54 = vmul.f32 %v872_v51, %v169_v26  ;;  %v199_v63 = vmul.f32 %v191_v47, %v57_v29  ;;  %v203_v13 = vadd.f32 %v728_v60, %v195_v0  ;;  %v350_v49 = vmul.f32 %v342_v6, %v204_v10 }
 0x13f   :  { %v876_v52 = vpop.eup %875  ;;  %v194_v55 = vmul.f32 %v874_v28, %v170_v30  ;;  %v200_v43 = vmul.f32 %v192_v59, %v57_v29  ;;  %v206_v17 = vadd.f32 %v728_v60, %v198_v62  ;;  %v351_v35 = vmul.f32 %v343_v8, %v205_v16 }
 0x140   :  { %v878_v33 = vpop.eup %877  ;;  %v337_v58 = vmul.f32 0.5, %v876_v52  ;;  %v201_v1 = vmul.f32 %v193_v54, %v57_v29  ;;  %v207_v18 = vadd.f32 %v728_v60, %v199_v63  ;;  %v349_v32 = vmul.f32 %v341_v5, %v203_v13 }
 0x141   :  { %v880_v53 = vpop.eup %879  ;;  %v338_v36 = vmul.f32 0.5, %v878_v33  ;;  %v202_v2 = vmul.f32 %v194_v55, %v57_v29  ;;  %v208_v21 = vadd.f32 %v728_v60, %v200_v43  ;;  %v352_v37 = vmul.f32 %v344_v27, %v206_v17 }
 0x142   :  { %v882_v7 = vpop.eup %881  ;;  %v339_v3 = vmul.f32 0.5, %v880_v53  ;;  %v345_v11 = vadd.f32 0.5, %v337_v58  ;;  %v209_v22 = vadd.f32 %v728_v60, %v201_v1  ;;  %v364_v48 = vsel %vm66_vm0, %v350_v49, 0.0 }
 0x143   :  { %v340_v4 = vmul.f32 0.5, %v882_v7  ;;  %v346_v14 = vadd.f32 0.5, %v338_v36  ;;  %v210_v23 = vadd.f32 %v728_v60, %v202_v2  ;;  %v357_v50 = vsel %vm66_vm0, %v349_v32, 0.0 }
 0x144   :  { %v347_v24 = vadd.f32 0.5, %v339_v3  ;;  %v353_v40 = vmul.f32 %v345_v11, %v207_v18  ;;  %v371_v51 = vsel %vm66_vm0, %v351_v35, 0.0  ;;  %v378_v26 = vsel %vm66_vm0, %v352_v37, 0.0 }
 0x145   :  { %v348_v25 = vadd.f32 0.5, %v340_v4  ;;  %v354_v41 = vmul.f32 %v346_v14, %v208_v21  ;;  %v365_v28 = vrot.slane %v364_v48, 4  ;;  %v358_v34 = vrot.slane %v357_v50, 4 }
 0x146   :  { %v355_v44 = vmul.f32 %v347_v24, %v209_v22  ;;  %v385_v30 = vsel %vm66_vm0, %v353_v40, 0.0  ;;  %v372_v33 = vrot.slane %v371_v51, 4  ;;  %v379_v45 = vrot.slane %v378_v26, 4 }
 0x147   :  { %v356_v46 = vmul.f32 %v348_v25, %v210_v23  ;;  %v392_v38 = vsel %vm66_vm0, %v354_v41, 0.0  ;;  %v386_v47 = vrot.slane %v385_v30, 4  ;;  %v366_v7 = vadd.f32 %v365_v28, %v364_v48 }
 0x148   :  { %v399_v52 = vsel %vm66_vm0, %v355_v44, 0.0  ;;  %v393_v53 = vrot.slane %v392_v38, 4  ;;  %v359_v31 = vadd.f32 %v358_v34, %v357_v50  ;;  %v373_v58 = vadd.f32 %v372_v33, %v371_v51 }
 0x149   :  { %v406_v29 = vsel %vm66_vm0, %v356_v46, 0.0  ;;  %v400_v54 = vrot.slane %v399_v52, 4  ;;  %v380_v36 = vadd.f32 %v379_v45, %v378_v26  ;;  %v387_v60 = vadd.f32 %v386_v47, %v385_v30 }
 0x14a   :  { %v407_v55 = vrot.slane %v406_v29, 4  ;;  %v394_v39 = vadd.f32 %v393_v53, %v392_v38  ;;  %v367_v43 = vrot.slane %v366_v7, 2  ;;  %v360_v1 = vrot.slane %v359_v31, 2 }
 0x14b   :  { %v401_v62 = vadd.f32 %v400_v54, %v399_v52  ;;  %v374_v3 = vrot.slane %v373_v58, 2  ;;  %v381_v4 = vrot.slane %v380_v36, 2  ;;  %v388_v5 = vrot.slane %v387_v60, 2 }
 0x14c   :  { %v408_v63 = vadd.f32 %v407_v55, %v406_v29  ;;  %v395_v8 = vrot.slane %v394_v39, 2  ;;  %v368_v13 = vadd.f32 %v367_v43, %v366_v7 }
 0x14d   :  { %v402_v10 = vrot.slane %v401_v62, 2  ;;  %v375_v27 = vadd.f32 %v374_v3, %v373_v58  ;;  %v382_v14 = vadd.f32 %v381_v4, %v380_v36  ;;  %v389_v16 = vadd.f32 %v388_v5, %v387_v60 }
 0x14e   :  { %v409_v11 = vrot.slane %v408_v63, 2  ;;  %v396_v17 = vadd.f32 %v395_v8, %v394_v39  ;;  %v369_v23 = vrot.slane %v368_v13, 1 }
 0x14f   :  { %v403_v18 = vadd.f32 %v402_v10, %v401_v62  ;;  %v376_v24 = vrot.slane %v375_v27, 1  ;;  %v383_v25 = vrot.slane %v382_v14, 1  ;;  %v390_v49 = vrot.slane %v389_v16, 1 }
 0x150   :  { %v410_v21 = vadd.f32 %v409_v11, %v408_v63  ;;  %v397_v32 = vrot.slane %v396_v17, 1  ;;  %v370_v41 = vadd.f32 %v369_v23, %v368_v13 }
 0x151   :  { %v404_v35 = vrot.slane %v403_v18, 1  ;;  %v377_v44 = vadd.f32 %v376_v24, %v375_v27  ;;  %v384_v46 = vadd.f32 %v383_v25, %v382_v14  ;;  %v391_v50 = vadd.f32 %v390_v49, %v389_v16 }
 0x152   :  { %v411_v37 = vrot.slane %v410_v21, 1  ;;  %v398_v51 = vadd.f32 %v397_v32, %v396_v17  ;;  %v414_v29 = vmax.f32 %v370_v41, 0.0 }
 0x153   :  { %v405_v26 = vadd.f32 %v404_v35, %v403_v18  ;;  %v415_v45 = vmax.f32 %v377_v44, 0.0  ;;  %v417_v47 = vmax.f32 %v391_v50, 0.0 }
 0x154   :  { %v412_v30 = vadd.f32 %v411_v37, %v410_v21  ;;  %v418_v53 = vmax.f32 %v398_v51, 0.0 }
 0x155   :  { %v419_v54 = vmax.f32 %v405_v26, 0.0  ;;  %v731_v26 = vld [vmem:[%s1225_s2 + $0x10] sm:$0xf] }
 0x156   :  { %v420_v55 = vmax.f32 %v412_v30, 0.0 }
 0x1ad   :  { %v526_v42 = vpop.xlane.xlu0 %525 }
 0x1ae   :  { %v532_v59 = vmul.f32 0.015625, %v526_v42  ;;  %v416_v42 = vmax.f32 %v384_v46, 0.0 }
 0x1af   :  { %v531_v57 = vpop.xlane.xlu1 %530 }
 0x1b0   :  { %v538_v12 = vsub.f32 %v1090_v20, %v532_v59  ;;  %v534_v61 = vmul.f32 %v532_v59, %v532_v59  ;;  %v533_v56 = vmul.f32 0.015625, %v531_v57  ;;  %v361_v20 = vadd.f32 %v360_v1, %v359_v31 }
 0x1b1   :  { %v537_v28 = vsub.f32 %v1088_v19, %v532_v59 }
 0x1b2   :  { %v535_v0 = vsub.f32 %v533_v56, %v534_v61  ;;  %v362_v22 = vrot.slane %v361_v20, 1 }
 0x1b4   :  { %v536_v2 = vmax.f32 %v535_v0, 0.0  ;;  %v363_v40 = vadd.f32 %v362_v22, %v361_v20 }
 0x1b6   :  { %v539_v6 = vadd.f32 1e-05, %v536_v2  ;;  %v413_v52 = vmax.f32 %v363_v40, 0.0 }
 0x1b8   :  { %883 = vrsqrt.f32 %v539_v6 }
 0x1c2   :  { %v884_v48 = vpop.eup %883 }
 0x1c3   :  { %v541_v38 = vmul.f32 0.1, %v884_v48 }
 0x1c5   :  { %v542_v34 = vmul.f32 %v541_v38, %v537_v28  ;;  %v1212_v33 = vmul.f32 %v541_v38, %v538_v12  ;;  %v710_v38 = vrot.slane %v731_v26, %v1102_v15 }
 0x1c7   :  { %v545_v7 = vrot.slane %v542_v34, 1  ;;  %v546_v57 = vrot.slane %v542_v34, 2  ;;  %v547_v31 = vrot.slane %v542_v34, 3  ;;  %v548_v61 = vrot.slane %v542_v34, 4 }
 0x1c8   :  { %v549_v56 = vrot.slane %v542_v34, 5  ;;  %v550_v58 = vrot.slane %v542_v34, 6  ;;  %v551_v36 = vrot.slane %v542_v34, 7  ;;  %v560_v19 = vadd.f32 %v542_v34, %v413_v52 }
 0x1c9   :  { %v561_v59 = vadd.f32 %v545_v7, %v414_v29  ;;  %v562_v60 = vadd.f32 %v546_v57, %v415_v45  ;;  %v563_v0 = vadd.f32 %v547_v31, %v416_v42  ;;  %v564_v39 = vadd.f32 %v548_v61, %v417_v47 }
 0x1ca   :  { %v565_v12 = vadd.f32 %v549_v56, %v418_v53  ;;  %v566_v62 = vadd.f32 %v550_v58, %v419_v54  ;;  %v567_v63 = vadd.f32 %v551_v36, %v420_v55  ;;  %v568_v4 = vmax.f32 %v560_v19, 0.0 }
 0x1cb   :  { %v569_v43 = vmax.f32 %v561_v59, 0.0  ;;  %v570_v1 = vmax.f32 %v562_v60, 0.0  ;;  %v571_v2 = vmax.f32 %v563_v0, 0.0  ;;  %v572_v3 = vmax.f32 %v564_v39, 0.0 }
 0x1cc   :  { %v573_v5 = vmax.f32 %v565_v12, 0.0  ;;  %v574_v10 = vmax.f32 %v566_v62, 0.0  ;;  %v575_v11 = vmax.f32 %v567_v63, 0.0 }
 0x1cd   :  { %v600_v6 = vrot.slane %v569_v43, 7  ;;  %v603_v8 = vrot.slane %v570_v1, 6  ;;  %v606_v13 = vrot.slane %v571_v2, 5  ;;  %v609_v14 = vrot.slane %v572_v3, 4 }
 0x1ce   :  { %v612_v17 = vrot.slane %v573_v5, 3  ;;  %v615_v21 = vrot.slane %v574_v10, 2  ;;  %v618_v23 = vrot.slane %v575_v11, 1 }
 0x1cf   :  { %v602_v20 = vsel %vm601_vm2, %v600_v6, %v568_v4 }
 0x1d0   :  { %v605_v27 = vsel %vm604_vm3, %v603_v8, %v602_v20 }
 0x1d1   :  { %v608_v16 = vsel %vm607_vm4, %v606_v13, %v605_v27 }
 0x1d2   :  { %v611_v18 = vsel %vm610_vm5, %v609_v14, %v608_v16 }
 0x1d3   :  { %v614_v22 = vsel %vm613_vm6, %v612_v17, %v611_v18 }
 0x1d4   :  { %v617_v24 = vsel %vm616_vm7, %v615_v21, %v614_v22 }
 0x1d5   :  { %v620_v25 = vsel %vm619_vm8, %v618_v23, %v617_v24 }
 0x1d6   :  { %782 = vmatmul.mubr.f32.vlgmr.msra.gmra.mrb[0].mxu1 %v620_v25 }
 0x2a9   :  { %v688_v49 = vpop.f32.mrb[0].mxu1 }
 0x2aa   :  { %692 = vadd.xlane.f32.xlu0 %v688_v49  ;;  %v783_v32 = vpop.f32.mrb[1].mxu1  ;;  %v694_v35 = vmul.f32 %v688_v49, %v688_v49 }
 0x2ac   :  { %695 = vadd.xlane.f32.xlu1 %v694_v35 }
 0x337   :  { %v693_v37 = vpop.xlane.xlu0 %692 }
 0x338   :  { %v697_v40 = vmul.f32 0.03125, %v693_v37 }
 0x339   :  { %v696_v41 = vpop.xlane.xlu1 %695 }
 0x33a   :  { %v699_v44 = vmul.f32 %v697_v40, %v697_v40  ;;  %v698_v46 = vmul.f32 0.03125, %v696_v41  ;;  %v702_v28 = vsub.f32 %v688_v49, %v697_v40 }
 0x33c   :  { %v700_v48 = vsub.f32 %v698_v46, %v699_v44 }
 0x33e   :  { %v701_v50 = vmax.f32 %v700_v48, 0.0 }
 0x340   :  { %v703_v51 = vadd.f32 1e-05, %v701_v50 }
 0x342   :  { %885 = vrsqrt.f32 %v703_v51 }
 0x34c   :  { %v886_v30 = vpop.eup %885 }
 0x34d   :  { %v705_v52 = vmul.f32 0.1, %v886_v30 }
 0x34f   :  { %v706_v29 = vmul.f32 %v705_v52, %v702_v28 }
 0x351   :  { %v711_v34 = vadd.f32 %v710_v38, %v706_v29 }
 0x353   :  { %v712_v45 = vadd.f32 %v711_v34, %v1212_v33 }
 0x355   :  { %v713_v42 = vmul.f32 0.5, %v712_v45 }
 0x357   :  { %887 = vtanh.f32 %v713_v42 }
 0x361   :  { %v888_v47 = vpop.eup %887 }
 0x362   :  { %v715_v53 = vmul.f32 0.5, %v888_v47 }
 0x364   :  { %v716_v54 = vadd.f32 0.5, %v715_v53 }
 0x366   :  { %v717_v55 = vsub.f32 1.0, %v716_v54  ;;  %v719_v57 = vmul.f32 %v716_v54, %v620_v25 }
 0x368   :  { %v718_v7 = vmul.f32 %v717_v55, %v1068_v9 }
 0x36a   :  { %v720_v31 = vadd.f32 %v719_v57, %v718_v7 }
 0x36c   :  { %721 = vst [vmem:[%s1228_s5] sm:$0xff] %v720_v31 }
 0x36d   :  { %726 = vsyncpa [#allocation3], 1 }
 0x36e   :  { %727 = vsyncpa [#allocation5], 1 }

</bundles_post_ra>
